<compile_context>
chip_gen: v6e
topology: v6e:2x2x1
jax: 0.10.0
libtpu: 0.0.40
codegen_flags: <defaults>
</compile_context>

<pallas_src>
import math
import functools
import numpy as np

import jax
import jax.numpy as jnp
from jax.experimental import pallas as pl
from jax.experimental.pallas import tpu as pltpu


def _round_up(x, m):
    return (x + m - 1) // m * m


# ---------------------------------------------------------------------------
# Tiled Pallas linear: y = x @ W + b   (W stored as (in, out), i.e. torch W.T)
# ---------------------------------------------------------------------------
def _linear_kernel(x_ref, w_ref, b_ref, o_ref, *, compute_dtype):
    x = x_ref[...]
    w = w_ref[...]
    if compute_dtype is not None:          # bf16 MXU operands, f32 accumulation
        x = x.astype(compute_dtype)
        w = w.astype(compute_dtype)
    y = jnp.dot(x, w, preferred_element_type=jnp.float32) + b_ref[...]
    o_ref[...] = y.astype(o_ref.dtype)


def pallas_linear(x, w, b, *, block_m=512, compute_dtype=None,
                  out_dtype=jnp.float32):
    """M-tiled linear; output emitted directly in out_dtype (so the bf16 value
    projection writes/reads HBM at half width)."""
    M, K = x.shape
    K2, Nf = w.shape
    assert K == K2
    bm = min(block_m, _round_up(M, 8))
    m_pad = _round_up(M, bm)
    if m_pad != M:
        x = jnp.pad(x, ((0, m_pad - M), (0, 0)))
    out = pl.pallas_call(
        functools.partial(_linear_kernel, compute_dtype=compute_dtype),
        out_shape=jax.ShapeDtypeStruct((m_pad, Nf), out_dtype),
        grid=(m_pad // bm,),
        in_specs=[pl.BlockSpec((bm, K), lambda i: (i, 0)),
                  pl.BlockSpec((K, Nf), lambda i: (0, 0)),
                  pl.BlockSpec((1, Nf), lambda i: (0, 0))],
        out_specs=pl.BlockSpec((bm, Nf), lambda i: (i, 0)),
        compiler_params=pltpu.CompilerParams(dimension_semantics=("parallel",)),
    )(x, w, b.reshape(1, Nf))
    return out[:M] if m_pad != M else out


# ---------------------------------------------------------------------------
# Factorized per-level deformable-attention gather kernel.
#
# Grid = (batch*head, query_tile), both "parallel".  Per grid point and per
# sampling point p (static loop):
#   rows = R_p (TQ, H_l) @ V_l (H_l, W_l*d_head)          -- MXU row gather
#   cw   = range-compare column weights over (TQ, W_l*d_head)
#   out += (rows * cw) @ fold(W_l*d_head, d_head)          -- MXU column fold
# Bilinear / attention coefficients (cw, fold, accumulation) stay in f32.
# ---------------------------------------------------------------------------
def _msdeform_level_kernel(v_ref, rw_ref, cs_ref, fold_ref, out_ref, *,
                           n_points, d_head):
    v = v_ref[0]                                     # (H_l, Wd) compute dtype
    fold = fold_ref[...]                             # (Wd, d_head) f32
    wd = v.shape[-1]
    tq = out_ref.shape[1]
    col = jax.lax.broadcasted_iota(jnp.int32, (tq, wd), 1)

    acc = jnp.zeros((tq, d_head), jnp.float32)
    for p in range(n_points):
        rwp = rw_ref[0, p]                           # (TQ, H_l) row 2-hot weights
        rows = jnp.dot(rwp, v, preferred_element_type=jnp.float32)   # (TQ, Wd)
        csp = cs_ref[0, p]                           # (TQ, 4) f32
        x0 = csp[:, 0:1].astype(jnp.int32)           # left column index (may be OOB)
        w0 = csp[:, 1:2]                             # (1 - lx) * attn
        w1 = csp[:, 2:3]                             # lx * attn
        lo = x0 * d_head
        # one range compare selects the two in-bounds bilinear columns; columns
        # outside [0, W_l) simply never match -> zero-padding border convention.
        in_span = (col >= lo) & (col < lo + 2 * d_head)
        cw = jnp.where(in_span, jnp.where(col < lo + d_head, w0, w1), 0.0)
        acc = acc + jnp.dot(rows * cw, fold, preferred_element_type=jnp.float32)
    out_ref[0] = acc


def _msdeform_level_call(v_l, rw, cs, fold, *, n_points, d_head, q_tile,
                         vmem_limit_bytes):
    B, H_l, Wd = v_l.shape
    _, P, Lqp, _ = rw.shape
    kernel = functools.partial(_msdeform_level_kernel,
                               n_points=n_points, d_head=d_head)
    return pl.pallas_call(
        kernel,
        out_shape=jax.ShapeDtypeStruct((B, Lqp, d_head), jnp.float32),
        grid=(B, Lqp // q_tile),
        in_specs=[
            pl.BlockSpec((1, H_l, Wd), lambda g, qt: (g, 0, 0)),
            pl.BlockSpec((1, P, q_tile, H_l), lambda g, qt: (g, 0, qt, 0)),
            pl.BlockSpec((1, P, q_tile, 4), lambda g, qt: (g, 0, qt, 0)),
            pl.BlockSpec((Wd, d_head), lambda g, qt: (0, 0)),
        ],
        out_specs=pl.BlockSpec((1, q_tile, d_head), lambda g, qt: (g, qt, 0)),
        compiler_params=pltpu.CompilerParams(
            dimension_semantics=("parallel", "parallel"),
            vmem_limit_bytes=vmem_limit_bytes),
    )(v_l, rw, cs, fold)


def msdeform_attn_core(value, sampling_locations, attention_weights,
                       spatial_shapes, level_start_index, n_heads, n_points,
                       *, q_tile=None, compute_dtype=None,
                       vmem_limit_bytes=48 * 1024 * 1024):
    """value: (N, Len_in, d_model) (already projected, maybe bf16)
       sampling_locations: (N, Len_q, n_heads, n_levels, n_points, 2) in [0, 1]
       attention_weights : (N, Len_q, n_heads, n_levels, n_points), softmaxed.
    Returns (N, Len_q, d_model) f32."""
    N, Len_in, d_model = value.shape
    Len_q = sampling_locations.shape[1]
    d_head = d_model // n_heads
    shapes = tuple((int(h), int(w)) for h, w in np.asarray(spatial_shapes))
    starts = tuple(int(s) for s in np.asarray(level_start_index))
    n_levels = len(shapes)

    vdt = value.dtype if compute_dtype is None else compute_dtype

    if q_tile is None:
        q_tile = min(128, _round_up(Len_q, 8))
    q_tile = max(8, _round_up(q_tile, 8))
    Lqp = _round_up(Len_q, q_tile)

    # ---- hoisted, grid-invariant sampling coefficient math (done once) -------
    Ws = jnp.asarray([float(w) for (_, w) in shapes], jnp.float32)
    Hs = jnp.asarray([float(h) for (h, _) in shapes], jnp.float32)
    loc = sampling_locations.astype(jnp.float32)
    attn = attention_weights.astype(jnp.float32)
    # grid_sample(align_corners=False) convention: pix = loc * size - 0.5
    x = loc[..., 0] * Ws[None, None, None, :, None] - 0.5      # (N,Lq,H,L,P)
    y = loc[..., 1] * Hs[None, None, None, :, None] - 0.5
    x0 = jnp.floor(x)
    y0 = jnp.floor(y)
    lx = x - x0
    ly = y - y0
    y0i = y0.astype(jnp.int32)
    w_col0 = (1.0 - lx) * attn
    w_col1 = lx * attn

    def to_head_major(a, last):
        # (N, Lq, H, P, last) -> (N*H, P, Lq_pad, last)
        a = jnp.transpose(a, (0, 2, 3, 1, 4)).reshape(N * n_heads, n_points,
                                                      Len_q, last)
        if Lqp != Len_q:
            a = jnp.pad(a, ((0, 0), (0, 0), (0, Lqp - Len_q), (0, 0)))
        return a

    out_acc = None
    for l, (H_l, W_l) in enumerate(shapes):
        start, size = starts[l], shapes[l][0] * shapes[l][1]
        # Level value in head-major layout: (N*H, H_l, W_l*d_head)
        v_lvl = value[:, start:start + size, :].reshape(N, H_l, W_l, n_heads,
                                                        d_head)
        v_lvl = jnp.transpose(v_lvl, (0, 3, 1, 2, 4)).reshape(
            N * n_heads, H_l, W_l * d_head).astype(vdt)

        # Row 2-hot weights (bilinear y-lerp + OOB masking by construction).
        ids = jnp.arange(H_l, dtype=jnp.int32)
        y0i_l = y0i[:, :, :, l, :]                              # (N,Lq,H,P)
        ly_l = ly[:, :, :, l, :]
        rw = ((ids == y0i_l[..., None]).astype(jnp.float32) * (1.0 - ly_l)[..., None]
              + (ids == y0i_l[..., None] + 1).astype(jnp.float32) * ly_l[..., None])
        rw = to_head_major(rw, H_l).astype(vdt)                 # (N*H,P,Lqp,H_l)

        # Column scalars per sample: [x0, (1-lx)*attn, lx*attn, 0] (f32).
        cs = jnp.stack([x0[:, :, :, l, :], w_col0[:, :, :, l, :],
                        w_col1[:, :, :, l, :],
                        jnp.zeros_like(x0[:, :, :, l, :])], axis=-1)
        cs = to_head_major(cs, 4).astype(jnp.float32)           # (N*H,P,Lqp,4)

        # Constant fold matrix: fold[x*d_head + c, c'] = [c == c']  (f32).
        fold = jnp.tile(jnp.eye(d_head, dtype=jnp.float32), (W_l, 1))

        out_l = _msdeform_level_call(v_lvl, rw, cs, fold,
                                     n_points=n_points, d_head=d_head,
                                     q_tile=q_tile,
                                     vmem_limit_bytes=vmem_limit_bytes)
        out_acc = out_l if out_acc is None else out_acc + out_l

    core = out_acc.reshape(N, n_heads, Lqp, d_head)[:, :, :Len_q, :]
    core = jnp.transpose(core, (0, 2, 1, 3)).reshape(N, Len_q, d_model)
    return core


# ---------------------------------------------------------------------------
# Parameter init — mirrors MSDeformAttn._reset_parameters()
# (weights stored transposed, (in, out), relative to torch nn.Linear).
# ---------------------------------------------------------------------------
def init_msdeform_params(key, d_model, n_levels, n_heads, n_points):
    k1, k2 = jax.random.split(key)
    thetas = jnp.arange(n_heads, dtype=jnp.float32) * (2.0 * math.pi / n_heads)
    grid_init = jnp.stack([jnp.cos(thetas), jnp.sin(thetas)], -1)
    grid_init = grid_init / jnp.max(jnp.abs(grid_init), -1, keepdims=True)
    grid_init = jnp.tile(grid_init.reshape(n_heads, 1, 1, 2),
                         (1, n_levels, n_points, 1))
    scale = jnp.arange(1, n_points + 1, dtype=jnp.float32).reshape(1, 1, n_points, 1)
    grid_init = grid_init * scale
    so_b = grid_init.reshape(-1)
    so_w = jnp.zeros((d_model, n_heads * n_levels * n_points * 2), jnp.float32)
    aw_w = jnp.zeros((d_model, n_heads * n_levels * n_points), jnp.float32)
    aw_b = jnp.zeros((n_heads * n_levels * n_points,), jnp.float32)
    bound = math.sqrt(6.0 / (d_model + d_model))   # xavier_uniform_
    vp_w = jax.random.uniform(k1, (d_model, d_model), jnp.float32, -bound, bound)
    vp_b = jnp.zeros((d_model,), jnp.float32)
    op_w = jax.random.uniform(k2, (d_model, d_model), jnp.float32, -bound, bound)
    op_b = jnp.zeros((d_model,), jnp.float32)
    return dict(so_w=so_w, so_b=so_b, aw_w=aw_w, aw_b=aw_b,
                vp_w=vp_w, vp_b=vp_b, op_w=op_w, op_b=op_b)


# ---------------------------------------------------------------------------
# Full MSDeformAttn forward (glue in JAX, hot paths in Pallas).
# input_spatial_shapes / input_level_start_index must be static (numpy/host).
# ---------------------------------------------------------------------------
def msdeform_attn_forward(params, query, reference_points, input_flatten,
                          input_spatial_shapes, input_level_start_index,
                          d_model, n_levels, n_heads, n_points,
                          input_padding_mask=None, compute_dtype=None,
                          q_tile=None):
    N, Len_q, _ = query.shape
    _, Len_in, _ = input_flatten.shape
    LP = n_levels * n_points
    shapes_np = np.asarray(input_spatial_shapes)

    value_dtype = jnp.float32 if compute_dtype is None else compute_dtype
    # value projection; output emitted directly in compute dtype (bf16 halves
    # the HBM write and the downstream value DMA).
    value = pallas_linear(input_flatten.reshape(N * Len_in, d_model),
                          params['vp_w'], params['vp_b'],
                          compute_dtype=compute_dtype,
                          out_dtype=value_dtype).reshape(N, Len_in, d_model)
    if input_padding_mask is not None:
        value = jnp.where(input_padding_mask[..., None],
                          jnp.zeros((), value.dtype), value)

    # fused sampling-offset + attention-weight projection (one pass over query)
    q2 = query.reshape(N * Len_q, d_model)
    w_cat = jnp.concatenate([params['so_w'], params['aw_w']], axis=1)
    b_cat = jnp.concatenate([params['so_b'], params['aw_b']], axis=0)
    qo = pallas_linear(q2, w_cat, b_cat, compute_dtype=compute_dtype,
                       out_dtype=jnp.float32)
    n_so = n_heads * LP * 2
    sampling_offsets = qo[:, :n_so].reshape(N, Len_q, n_heads, n_levels,
                                            n_points, 2)
    attn_logits = qo[:, n_so:].reshape(N, Len_q, n_heads, LP)
    attn = jax.nn.softmax(attn_logits, axis=-1).reshape(
        N, Len_q, n_heads, n_levels, n_points)

    if reference_points.shape[-1] == 2:
        offset_normalizer = jnp.asarray(
            np.stack([shapes_np[:, 1], shapes_np[:, 0]], -1), jnp.float32)  # (w,h)
        sampling_locations = (reference_points[:, :, None, :, None, :]
                              + sampling_offsets
                              / offset_normalizer[None, None, None, :, None, :])
    elif reference_points.shape[-1] == 4:
        sampling_locations = (reference_points[:, :, None, :, None, :2]
                              + sampling_offsets / n_points
                              * reference_points[:, :, None, :, None, 2:] * 0.5)
    else:
        raise ValueError("Last dim of reference_points must be 2 or 4.")

    core = msdeform_attn_core(value, sampling_locations, attn,
                              input_spatial_shapes, input_level_start_index,
                              n_heads, n_points, q_tile=q_tile,
                              compute_dtype=compute_dtype)

    out = pallas_linear(core.reshape(N * Len_q, d_model),
                        params['op_w'], params['op_b'],
                        compute_dtype=compute_dtype,
                        out_dtype=jnp.float32).reshape(N, Len_q, d_model)
    return out


# ---------------------------------------------------------------------------
# Pure-JAX reference (mirrors multi_scale_deformable_attn_pytorch semantics).
# ---------------------------------------------------------------------------
def _ref_core(value_nlhd, spatial_shapes_np, level_start_np, samp_loc, attn_w):
    N, Len_in, Hn, d_head = value_nlhd.shape
    L, P = attn_w.shape[3], attn_w.shape[4]
    Len_q = samp_loc.shape[1]
    out = jnp.zeros((N, Len_q, Hn, d_head), jnp.float32)
    for l in range(L):
        Hl, Wl = int(spatial_shapes_np[l, 0]), int(spatial_shapes_np[l, 1])
        start = int(level_start_np[l])
        v = value_nlhd[:, start:start + Hl * Wl].reshape(N, Hl, Wl, Hn, d_head)
        for p in range(P):
            x = samp_loc[:, :, :, l, p, 0] * Wl - 0.5
            y = samp_loc[:, :, :, l, p, 1] * Hl - 0.5
            x0 = jnp.floor(x).astype(jnp.int32)
            y0 = jnp.floor(y).astype(jnp.int32)
            lx = x - x0
            ly = y - y0
            w = attn_w[:, :, :, l, p]
            for dy, dx, cw in ((0, 0, (1 - ly) * (1 - lx)), (0, 1, (1 - ly) * lx),
                               (1, 0, ly * (1 - lx)), (1, 1, ly * lx)):
                ix = x0 + dx
                iy = y0 + dy
                valid = (ix >= 0) & (ix < Wl) & (iy >= 0) & (iy < Hl)
                ixc = jnp.clip(ix, 0, Wl - 1)
                iyc = jnp.clip(iy, 0, Hl - 1)
                samples = v[jnp.arange(N)[:, None, None], iyc, ixc,
                            jnp.arange(Hn)[None, None, :], :]
                out = out + (w * cw * valid)[..., None] * samples
    return out.reshape(N, Len_q, Hn * d_head)


def _reference_forward(params, query, reference_points, input_flatten,
                       spatial_shapes_np, level_start_np,
                       d_model, n_levels, n_heads, n_points):
    N, Len_q, _ = query.shape
    _, Len_in, _ = input_flatten.shape
    d_head = d_model // n_heads
    value = input_flatten @ params['vp_w'] + params['vp_b']
    value = value.reshape(N, Len_in, n_heads, d_head)
    q2 = query.reshape(N * Len_q, d_model)
    so = (q2 @ params['so_w'] + params['so_b']).reshape(
        N, Len_q, n_heads, n_levels, n_points, 2)
    aw = (q2 @ params['aw_w'] + params['aw_b']).reshape(
        N, Len_q, n_heads, n_levels * n_points)
    aw = jax.nn.softmax(aw, -1).reshape(N, Len_q, n_heads, n_levels, n_points)
    norm = jnp.stack([jnp.asarray(spatial_shapes_np)[:, 1],
                      jnp.asarray(spatial_shapes_np)[:, 0]], -1).astype(jnp.float32)
    loc = (reference_points[:, :, None, :, None, :]
           + so / norm[None, None, None, :, None, :])
    core = _ref_core(value, spatial_shapes_np, level_start_np, loc, aw)
    return core @ params['op_w'] + params['op_b']


if __name__ == "__main__":
    d_model, n_levels, n_heads, n_points = 32, 2, 4, 2
    spatial_shapes_np = np.array([[8, 8], [4, 4]], dtype=np.int32)
    sizes = spatial_shapes_np[:, 0] * spatial_shapes_np[:, 1]
    level_start_np = np.concatenate([[0], np.cumsum(sizes)[:-1]]).astype(np.int32)
    Len_in = int(sizes.sum())          # 80
    N, Len_q = 2, 12                   # Len_q not a multiple of 8: exercises padding

    key = jax.random.PRNGKey(0)
    kp, kq, kr, kf = jax.random.split(key, 4)
    params = init_msdeform_params(kp, d_model, n_levels, n_heads, n_points)
    query = jax.random.normal(kq, (N, Len_q, d_model), jnp.float32)
    reference_points = jax.random.uniform(kr, (N, Len_q, n_levels, 2), jnp.float32)
    input_flatten = jax.random.normal(kf, (N, Len_in, d_model), jnp.float32)

    ref = _reference_forward(params, query, reference_points, input_flatten,
                             spatial_shapes_np, level_start_np,
                             d_model, n_levels, n_heads, n_points)
    ref = np.asarray(jax.block_until_ready(ref))

    # 1) f32 path with an 8-wide query tile: exercises the multi-tile query grid
    #    axis, Len_q padding, per-level factorized gathers and OOB handling.
    out_f32 = msdeform_attn_forward(params, query, reference_points, input_flatten,
                                    spatial_shapes_np, level_start_np,
                                    d_model, n_levels, n_heads, n_points,
                                    compute_dtype=None, q_tile=8)
    out_f32 = np.asarray(jax.block_until_ready(out_f32))
    np.testing.assert_allclose(out_f32, ref, rtol=1e-3, atol=1e-3)

    # 2) Production config: bf16 value / row-weight matmul operands (f32
    #    coefficients and accumulation), default query tiling.
    out_bf16 = msdeform_attn_forward(params, query, reference_points, input_flatten,
                                     spatial_shapes_np, level_start_np,
                                     d_model, n_levels, n_heads, n_points,
                                     compute_dtype=jnp.bfloat16)
    out_bf16 = np.asarray(jax.block_until_ready(out_bf16))
    np.testing.assert_allclose(out_bf16, ref, rtol=1e-1, atol=1e-1)

    print("KERNEL_OK")
</pallas_src>

<mosaic_0001>
module attributes {stable_mosaic.version = 11 : i64} {
  func.func @_linear_kernel(%arg0: i32, %arg1: memref<160x32xf32, #tpu.memory_space<vmem>>, %arg2: memref<32x32xf32, #tpu.memory_space<vmem>>, %arg3: memref<1x32xf32, #tpu.memory_space<vmem>>, %arg4: memref<160x32xf32, #tpu.memory_space<vmem>>) attributes {dimension_semantics = [#tpu.dimension_semantics<parallel>], iteration_bounds = array<i64: 1>, scalar_prefetch = 0 : i64, scratch_operands = 0 : i64, tpu.core_type = #tpu.core_type<tc>, window_params = [{transform_indices = @transform_0, window_bounds = array<i64: 160, 32>}, {pipeline_mode = #tpu.pipeline_mode<synchronous>, transform_indices = @transform_1, window_bounds = array<i64: 32, 32>}, {pipeline_mode = #tpu.pipeline_mode<synchronous>, transform_indices = @transform_2, window_bounds = array<i64: 1, 32>}, {transform_indices = @transform_3, window_bounds = array<i64: 160, 32>}]} {
    %c0 = arith.constant 0 : index
    %c0_0 = arith.constant 0 : index
    %0 = vector.load %arg1[%c0, %c0_0] : memref<160x32xf32, #tpu.memory_space<vmem>>, vector<160x32xf32>
    %c0_1 = arith.constant 0 : index
    %c0_2 = arith.constant 0 : index
    %1 = vector.load %arg2[%c0_1, %c0_2] : memref<32x32xf32, #tpu.memory_space<vmem>>, vector<32x32xf32>
    %cst = arith.constant dense<0.000000e+00> : vector<160x32xf32>
    %2 = tpu.matmul %0, %1, %cst {dimension_numbers = #tpu.dot_dimension_numbers<[1], [0], [0], [1], [0, 0, 1, 1], [], []>} : vector<160x32xf32>, vector<32x32xf32>, vector<160x32xf32> -> vector<160x32xf32>
    %c0_3 = arith.constant 0 : index
    %c0_4 = arith.constant 0 : index
    %3 = vector.load %arg3[%c0_3, %c0_4] : memref<1x32xf32, #tpu.memory_space<vmem>>, vector<1x32xf32>
    %4 = vector.broadcast %3 : vector<1x32xf32> to vector<160x32xf32>
    %5 = arith.addf %2, %4 : vector<160x32xf32>
    %c0_5 = arith.constant 0 : index
    %c0_6 = arith.constant 0 : index
    %6 = vector.load %arg4[%c0_5, %c0_6] : memref<160x32xf32, #tpu.memory_space<vmem>>, vector<160x32xf32>
    tpu.vector_store %arg4[%c0_5, %c0_6], %5 {strides = array<i32>} : memref<160x32xf32, #tpu.memory_space<vmem>>, vector<160x32xf32>,
    return
  }
  func.func @transform_0(%arg0: i32) -> (i32, i32) {
    %c0_i32 = arith.constant 0 : i32
    %c0_i32_0 = arith.constant 0 : i32
    return %arg0, %c0_i32 : i32, i32
  }
  func.func @transform_1(%arg0: i32) -> (i32, i32) {
    %c0_i32 = arith.constant 0 : i32
    %c0_i32_0 = arith.constant 0 : i32
    %c0_i32_1 = arith.constant 0 : i32
    return %c0_i32, %c0_i32_0 : i32, i32
  }
  func.func @transform_2(%arg0: i32) -> (i32, i32) {
    %c0_i32 = arith.constant 0 : i32
    %c0_i32_0 = arith.constant 0 : i32
    %c0_i32_1 = arith.constant 0 : i32
    return %c0_i32, %c0_i32_0 : i32, i32
  }
  func.func @transform_3(%arg0: i32) -> (i32, i32) {
    %c0_i32 = arith.constant 0 : i32
    %c0_i32_0 = arith.constant 0 : i32
    return %arg0, %c0_i32 : i32, i32
  }
}

</mosaic_0001>

<bundles_post_ra>
// kernel: tpu_custom_call.1
= control target key start
LH: loop header
LB: loop body
LE: loop exit
PB: predicated region body
PF: predicated region fallthrough
CT: control target
= control target key end

     0   :  { %vm45_vm0 = vcmask 261120   ;;  %s581_s1 = inlined_call_operand.vmem [shape: f32[32,32], index: 1, kind: input, shape index: {}]   ;;  %s582_s0 = inlined_call_operand.vmem [shape: f32[160,32], index: 0, kind: input, shape index: {}]   ;;  %s583_s2 = inlined_call_operand.vmem [shape: f32[1,32], index: 2, kind: input, shape index: {}]   ;;  %s584_s3 = inlined_call_operand.vmem [shape: f32[160,32], index: 3, kind: output, shape index: {}]  }
   0x1   :  { %v37_v0 = vld [vmem:[%s581_s1 + $0x18] sm:$0xff]  ;;  %v36_v1 = vld [vmem:[%s581_s1 + $0x10] sm:$0xff]  ;;  %v35_v2 = vld [vmem:[%s581_s1 + $0x8] sm:$0xff] }
   0x2   :  { %340 = vmatprep.subr.mxu0 %v37_v0  ;;  %378 = vmatprep.subr.mxu1 %v37_v0  ;;  %v34_v3 = vld [vmem:[%s581_s1] sm:$0xff]  ;;  %v24_v5 = vld [vmem:[%s582_s0 + $0x50] sm:$0xff]  ;;  %v15_v6 = vld [vmem:[%s582_s0 + $0x8] sm:$0xff] }
   0x3   :  { %341 = vmatpush3.msra.mxu0 %v37_v0  ;;  %382 = vmatpush3.msra.mxu1 %v37_v0  ;;  %v14_v4 = vld [vmem:[%s582_s0] sm:$0xff]  ;;  %v25_v7 = vld [vmem:[%s582_s0 + $0x58] sm:$0xff]  ;;  %v16_v8 = vld [vmem:[%s582_s0 + $0x10] sm:$0xff] }
   0x4   :  { %342 = vmatprep.subr.mxu0 %v36_v1  ;;  %379 = vmatprep.subr.mxu1 %v36_v1  ;;  %v26_v9 = vld [vmem:[%s582_s0 + $0x60] sm:$0xff]  ;;  %v17_v10 = vld [vmem:[%s582_s0 + $0x18] sm:$0xff]  ;;  %v27_v11 = vld [vmem:[%s582_s0 + $0x68] sm:$0xff] }
   0x5   :  { %343 = vmatpush3.msra.mxu0 %v36_v1  ;;  %383 = vmatpush3.msra.mxu1 %v36_v1  ;;  %v18_v12 = vld [vmem:[%s582_s0 + $0x20] sm:$0xff]  ;;  %v28_v13 = vld [vmem:[%s582_s0 + $0x70] sm:$0xff]  ;;  %v19_v14 = vld [vmem:[%s582_s0 + $0x28] sm:$0xff] }
   0x6   :  { %344 = vmatprep.subr.mxu0 %v35_v2  ;;  %380 = vmatprep.subr.mxu1 %v35_v2  ;;  %v29_v15 = vld [vmem:[%s582_s0 + $0x78] sm:$0xff]  ;;  %v20_v16 = vld [vmem:[%s582_s0 + $0x30] sm:$0xff]  ;;  %v30_v17 = vld [vmem:[%s582_s0 + $0x80] sm:$0xff] }
   0x7   :  { %345 = vmatpush3.msra.mxu0 %v35_v2  ;;  %384 = vmatpush3.msra.mxu1 %v35_v2  ;;  %v21_v18 = vld [vmem:[%s582_s0 + $0x38] sm:$0xff]  ;;  %v31_v19 = vld [vmem:[%s582_s0 + $0x88] sm:$0xff]  ;;  %v22_v20 = vld [vmem:[%s582_s0 + $0x40] sm:$0xff] }
   0x8   :  { %346 = vmatprep.subr.mxu0 %v34_v3  ;;  %381 = vmatprep.subr.mxu1 %v34_v3  ;;  %v32_v21 = vld [vmem:[%s582_s0 + $0x90] sm:$0xff]  ;;  %v23_v22 = vld [vmem:[%s582_s0 + $0x48] sm:$0xff]  ;;  %v33_v23 = vld [vmem:[%s582_s0 + $0x98] sm:$0xff] }
   0x9   :  { %347 = vmatpush3.msra.mxu0 %v34_v3  ;;  %385 = vmatpush3.msra.mxu1 %v34_v3  ;;  %v295_v24 = vld [vmem:[%s583_s2] ss:$0 sm:$0xff] }
   0xa   :  { %348 = vmatprep.mubr.msk.f32.mxu0 %vm45_vm0, %v14_v4  ;;  %363 = vmatprep.mubr.msk.f32.mxu1 %vm45_vm0, %v24_v5 }
   0xb   :  { %349 = vmatmul.mubr.msk.f32.vlgmr.msra.gmra.mxu0 %vm45_vm0, %v15_v6  ;;  %364 = vmatmul.mubr.msk.f32.vlgmr.msra.gmra.mxu1 %vm45_vm0, %v25_v7 }
   0xc   :  { %351 = vmatprep.mubr.msk.f32.mxu0 %vm45_vm0, %v16_v8  ;;  %366 = vmatprep.mubr.msk.f32.mxu1 %vm45_vm0, %v26_v9 }
   0xf   :  { %352 = vmatmul.mubr.msk.f32.gmra.mxu0 %vm45_vm0, %v17_v10  ;;  %367 = vmatmul.mubr.msk.f32.gmra.mxu1 %vm45_vm0, %v27_v11 }
  0x10   :  { %354 = vmatprep.mubr.msk.f32.mxu0 %vm45_vm0, %v18_v12  ;;  %369 = vmatprep.mubr.msk.f32.mxu1 %vm45_vm0, %v28_v13 }
  0x13   :  { %355 = vmatmul.mubr.msk.f32.gmra.mxu0 %vm45_vm0, %v19_v14  ;;  %370 = vmatmul.mubr.msk.f32.gmra.mxu1 %vm45_vm0, %v29_v15 }
  0x14   :  { %357 = vmatprep.mubr.msk.f32.mxu0 %vm45_vm0, %v20_v16  ;;  %372 = vmatprep.mubr.msk.f32.mxu1 %vm45_vm0, %v30_v17 }
  0x17   :  { %358 = vmatmul.mubr.msk.f32.gmra.mxu0 %vm45_vm0, %v21_v18  ;;  %373 = vmatmul.mubr.msk.f32.gmra.mxu1 %vm45_vm0, %v31_v19 }
  0x18   :  { %360 = vmatprep.mubr.msk.f32.mxu0 %vm45_vm0, %v22_v20  ;;  %375 = vmatprep.mubr.msk.f32.mxu1 %vm45_vm0, %v32_v21 }
  0x1b   :  { %361 = vmatmul.mubr.msk.f32.gmra.mxu0 %vm45_vm0, %v23_v22  ;;  %376 = vmatmul.mubr.msk.f32.gmra.mxu1 %vm45_vm0, %v33_v23 }
  0xcb   :  { %v350_v25 = vpop.f32.mrf.mxu0  ;;  %v365_v26 = vpop.f32.mrf.mxu1 }
  0xcc   :  { %v178_v27 = vadd.f32 %v350_v25, %v295_v24  ;;  %v228_v28 = vadd.f32 %v365_v26, %v295_v24 }
  0xcd   :  { %v172_v29 = vpop.f32.mrf.mxu0  ;;  %v222_v30 = vpop.f32.mrf.mxu1 }
  0xce   :  { %272 = vst.msk [vmem:[%s584_s3 + $0x8] sm:$0xff] %vm45_vm0, %v178_v27  ;;  %282 = vst.msk [vmem:[%s584_s3 + $0x58] sm:$0xff] %vm45_vm0, %v228_v28  ;;  %v173_v31 = vadd.f32 %v295_v24, %v172_v29  ;;  %v223_v32 = vadd.f32 %v295_v24, %v222_v30 }
  0xcf   :  { %v353_v33 = vpop.f32.mrf.mxu0  ;;  %v368_v34 = vpop.f32.mrf.mxu1 }
  0xd0   :  { %271 = vst.msk [vmem:[%s584_s3] sm:$0xff] %vm45_vm0, %v173_v31  ;;  %281 = vst.msk [vmem:[%s584_s3 + $0x50] sm:$0xff] %vm45_vm0, %v223_v32  ;;  %v188_v35 = vadd.f32 %v353_v33, %v295_v24  ;;  %v238_v36 = vadd.f32 %v368_v34, %v295_v24 }
  0xd1   :  { %v182_v37 = vpop.f32.mrf.mxu0  ;;  %v232_v38 = vpop.f32.mrf.mxu1 }
  0xd2   :  { %274 = vst.msk [vmem:[%s584_s3 + $0x18] sm:$0xff] %vm45_vm0, %v188_v35  ;;  %284 = vst.msk [vmem:[%s584_s3 + $0x68] sm:$0xff] %vm45_vm0, %v238_v36  ;;  %v183_v39 = vadd.f32 %v295_v24, %v182_v37  ;;  %v233_v40 = vadd.f32 %v295_v24, %v232_v38 }
  0xd3   :  { %v356_v41 = vpop.f32.mrf.mxu0  ;;  %v371_v42 = vpop.f32.mrf.mxu1 }
  0xd4   :  { %273 = vst.msk [vmem:[%s584_s3 + $0x10] sm:$0xff] %vm45_vm0, %v183_v39  ;;  %283 = vst.msk [vmem:[%s584_s3 + $0x60] sm:$0xff] %vm45_vm0, %v233_v40  ;;  %v198_v43 = vadd.f32 %v356_v41, %v295_v24  ;;  %v248_v44 = vadd.f32 %v371_v42, %v295_v24 }
  0xd5   :  { %v192_v45 = vpop.f32.mrf.mxu0  ;;  %v242_v46 = vpop.f32.mrf.mxu1 }
  0xd6   :  { %276 = vst.msk [vmem:[%s584_s3 + $0x28] sm:$0xff] %vm45_vm0, %v198_v43  ;;  %286 = vst.msk [vmem:[%s584_s3 + $0x78] sm:$0xff] %vm45_vm0, %v248_v44  ;;  %v193_v47 = vadd.f32 %v295_v24, %v192_v45  ;;  %v243_v48 = vadd.f32 %v295_v24, %v242_v46 }
  0xd7   :  { %v359_v49 = vpop.f32.mrf.mxu0  ;;  %v374_v50 = vpop.f32.mrf.mxu1 }
  0xd8   :  { %275 = vst.msk [vmem:[%s584_s3 + $0x20] sm:$0xff] %vm45_vm0, %v193_v47  ;;  %285 = vst.msk [vmem:[%s584_s3 + $0x70] sm:$0xff] %vm45_vm0, %v243_v48  ;;  %v208_v51 = vadd.f32 %v359_v49, %v295_v24  ;;  %v258_v52 = vadd.f32 %v374_v50, %v295_v24 }
  0xd9   :  { %v202_v53 = vpop.f32.mrf.mxu0  ;;  %v252_v54 = vpop.f32.mrf.mxu1 }
  0xda   :  { %278 = vst.msk [vmem:[%s584_s3 + $0x38] sm:$0xff] %vm45_vm0, %v208_v51  ;;  %288 = vst.msk [vmem:[%s584_s3 + $0x88] sm:$0xff] %vm45_vm0, %v258_v52  ;;  %v203_v55 = vadd.f32 %v295_v24, %v202_v53  ;;  %v253_v56 = vadd.f32 %v295_v24, %v252_v54 }
  0xdb   :  { %v362_v57 = vpop.f32.mrf.mxu0  ;;  %v377_v58 = vpop.f32.mrf.mxu1 }
  0xdc   :  { %277 = vst.msk [vmem:[%s584_s3 + $0x30] sm:$0xff] %vm45_vm0, %v203_v55  ;;  %287 = vst.msk [vmem:[%s584_s3 + $0x80] sm:$0xff] %vm45_vm0, %v253_v56  ;;  %v218_v59 = vadd.f32 %v362_v57, %v295_v24  ;;  %v268_v60 = vadd.f32 %v377_v58, %v295_v24 }
  0xdd   :  { %v212_v61 = vpop.f32.mrf.mxu0  ;;  %v262_v62 = vpop.f32.mrf.mxu1 }
  0xde   :  { %280 = vst.msk [vmem:[%s584_s3 + $0x48] sm:$0xff] %vm45_vm0, %v218_v59  ;;  %290 = vst.msk [vmem:[%s584_s3 + $0x98] sm:$0xff] %vm45_vm0, %v268_v60  ;;  %v213_v63 = vadd.f32 %v295_v24, %v212_v61  ;;  %v263_v0 = vadd.f32 %v295_v24, %v262_v62 }
  0xe0   :  { %279 = vst.msk [vmem:[%s584_s3 + $0x40] sm:$0xff] %vm45_vm0, %v213_v63  ;;  %289 = vst.msk [vmem:[%s584_s3 + $0x90] sm:$0xff] %vm45_vm0, %v263_v0 }

</bundles_post_ra>
